<compile_context>
chip_gen: v7x
topology: tpu7x:2x2x1
jax: 0.10.0
libtpu: 0.0.40
codegen_flags: <defaults>
</compile_context>

<pallas_src>
import functools

import jax
import jax.numpy as jnp
from jax import lax
from jax.experimental import pallas as pl
from jax.experimental.pallas import tpu as pltpu

INPUT_SIZE = 784
HIDDEN_SIZE = 100
NUM_CLASSES = 10
DROPOUT_P = 0.1

HIDDEN_PAD = 128                     # lane-aligned hidden dim (100 -> 128)
MXU_DTYPE = jnp.bfloat16             # MXU operand dtype (f32 accumulation)
DROP_THRESHOLD = int(DROPOUT_P * (1 << 32))   # drop iff hash_bits < threshold


def _cdiv(a, b):
    return -(-a // b)


def _round_up(x, m):
    return (x + m - 1) // m * m


def _default_batch_tile():
    """Pick a batch tile per TPU generation (safe fallback: 1024)."""
    try:
        kind = jax.devices()[0].device_kind.lower()
    except Exception:
        return 1024
    if "v6" in kind or "v7" in kind:
        return 2048        # ~13 MiB VMEM footprint, fits 32 MiB default limit
    return 1024            # v5e (16 MiB default scoped VMEM) / unknown / CPU


def _lowbias32(k):
    """Stateless 32-bit integer mixer (lowbias32). Pure VPU ops."""
    k ^= k >> 16
    k *= jnp.uint32(0x7FEB352D)
    k ^= k >> 15
    k *= jnp.uint32(0x846CA68B)
    k ^= k >> 16
    return k


def _mlp_kernel(seed_ref, x_ref, w1_ref, b1_ref, w2_ref, b2_ref, o_ref,
                *, block_rows, drop_threshold, training):
    # l1: (TB, 784)bf16 @ (784, 128)bf16 -> f32, + bias, ReLU
    xb = x_ref[...].astype(MXU_DTYPE)
    h = jnp.dot(xb, w1_ref[...], preferred_element_type=jnp.float32)
    h = jnp.maximum(h + b1_ref[...], 0.0)

    # dropout1 (training only; eval-mode nn.Dropout is the identity)
    if training and drop_threshold > 0:
        # Counter-based hash over (global_row, col) mixed with the seed:
        # deterministic, independent of tiling along columns, no stateful PRNG.
        row0 = pl.program_id(0).astype(jnp.uint32) * jnp.uint32(block_rows)
        rows = lax.broadcasted_iota(jnp.int32, h.shape, 0).astype(jnp.uint32) + row0
        cols = lax.broadcasted_iota(jnp.int32, h.shape, 1).astype(jnp.uint32)
        ctr = rows * jnp.uint32(h.shape[1]) + cols
        k = ctr ^ (seed_ref[0].astype(jnp.uint32) * jnp.uint32(0x9E3779B9))
        bits = _lowbias32(k)
        keep = bits >= jnp.uint32(drop_threshold)      # P(drop) = p
        # 1/(1-p) rescale is folded into w2 host-side (l2 is linear).
        h = jnp.where(keep, h, 0.0)

    # l2: (TB, 128)bf16 @ (128, 10)bf16 -> f32, + bias.  Compact 10-wide store:
    # output volume is tiny, so masked stores are cheaper than a padded
    # 128-lane writeback + post-kernel slice.
    out = jnp.dot(h.astype(MXU_DTYPE), w2_ref[...],
                  preferred_element_type=jnp.float32)
    o_ref[...] = (out + b2_ref[...]).astype(o_ref.dtype)


def neural_net_forward(x, w1, b1, w2, b2, *, seed=0, training=False,
                       batch_tile=None):
    """Fused forward pass of NeuralNet.

    x  : (B, 784) float32 (or bfloat16 — preferred if produced upstream,
         halves the dominant HBM read stream)
    w1 : (784, 100) float32   (transposed PyTorch l1.weight)
    b1 : (100,)     float32
    w2 : (100, 10)  float32   (transposed PyTorch l2.weight)
    b2 : (10,)      float32
    returns (B, 10) float32
    """
    batch = x.shape[0]
    if batch_tile is None:
        batch_tile = _default_batch_tile()

    # Balanced ragged tiling: tb is the smallest multiple of 8 that covers the
    # batch in n_tiles equal tiles (minimizes zero padding for awkward B).
    n_tiles = _cdiv(batch, batch_tile)
    tb = _round_up(_cdiv(batch, n_tiles), 8)
    b_pad = n_tiles * tb
    if b_pad != batch:
        x = jnp.pad(x, ((0, b_pad - batch), (0, 0)))

    # Host-side (once): pad hidden dim to 128 lanes, cast weights to bf16,
    # fold the inverted-dropout rescale into w2 when training.
    w1p = jnp.pad(w1, ((0, 0), (0, HIDDEN_PAD - HIDDEN_SIZE))).astype(MXU_DTYPE)
    b1p = jnp.pad(b1, (0, HIDDEN_PAD - HIDDEN_SIZE)).reshape(1, HIDDEN_PAD)
    b1p = b1p.astype(jnp.float32)
    w2_eff = w2 * (1.0 / (1.0 - DROPOUT_P)) if (training and DROPOUT_P > 0.0) else w2
    w2p = jnp.pad(w2_eff, ((0, HIDDEN_PAD - HIDDEN_SIZE), (0, 0))).astype(MXU_DTYPE)
    b2p = b2.reshape(1, NUM_CLASSES).astype(jnp.float32)

    seed_arr = jnp.asarray([seed], dtype=jnp.int32)
    kernel = functools.partial(_mlp_kernel,
                               block_rows=tb,
                               drop_threshold=DROP_THRESHOLD,
                               training=training)

    out = pl.pallas_call(
        kernel,
        out_shape=jax.ShapeDtypeStruct((b_pad, NUM_CLASSES), jnp.float32),
        grid_spec=pltpu.PrefetchScalarGridSpec(
            num_scalar_prefetch=1,            # seed -> SMEM
            grid=(n_tiles,),
            in_specs=[
                # x: one batch tile per grid step (double-buffered by Pallas)
                pl.BlockSpec((tb, INPUT_SIZE), lambda i, s: (i, 0)),
                # weights / biases: constant index -> VMEM-resident
                pl.BlockSpec((INPUT_SIZE, HIDDEN_PAD), lambda i, s: (0, 0)),
                pl.BlockSpec((1, HIDDEN_PAD), lambda i, s: (0, 0)),
                pl.BlockSpec((HIDDEN_PAD, NUM_CLASSES), lambda i, s: (0, 0)),
                pl.BlockSpec((1, NUM_CLASSES), lambda i, s: (0, 0)),
            ],
            # Compact (tb, 10) output: last dim equals the full array dim.
            out_specs=pl.BlockSpec((tb, NUM_CLASSES), lambda i, s: (i, 0)),
        ),
        compiler_params=pltpu.CompilerParams(
            # Pure data-parallel over batch tiles.
            dimension_semantics=("parallel",)),
    )(seed_arr, x, w1p, b1p, w2p, b2p)

    return out[:batch] if b_pad != batch else out


def _init_params(key):
    """Deterministic init mimicking nn.Linear's default (uniform +-1/sqrt(fan_in))."""
    k1, k2, k3, k4 = jax.random.split(key, 4)
    lim1 = 1.0 / jnp.sqrt(INPUT_SIZE)
    lim2 = 1.0 / jnp.sqrt(HIDDEN_SIZE)
    w1 = jax.random.uniform(k1, (INPUT_SIZE, HIDDEN_SIZE), jnp.float32, -lim1, lim1)
    b1 = jax.random.uniform(k2, (HIDDEN_SIZE,), jnp.float32, -lim1, lim1)
    w2 = jax.random.uniform(k3, (HIDDEN_SIZE, NUM_CLASSES), jnp.float32, -lim2, lim2)
    b2 = jax.random.uniform(k4, (NUM_CLASSES,), jnp.float32, -lim2, lim2)
    return w1, b1, w2, b2


if __name__ == "__main__":
    key = jax.random.PRNGKey(0)
    kx, kp = jax.random.split(key)

    batch = 8
    x = jax.random.normal(kx, (batch, INPUT_SIZE), dtype=jnp.float32)
    w1, b1, w2, b2 = _init_params(kp)

    # Eval mode (dropout = identity): must match the plain-JAX f32 reference
    # within bf16-operand / f32-accumulate tolerance.
    out = neural_net_forward(x, w1, b1, w2, b2, training=False)
    out = jax.block_until_ready(out)
    ref = jnp.maximum(x @ w1 + b1, 0.0) @ w2 + b2
    assert out.shape == (batch, NUM_CLASSES)
    assert jnp.allclose(out, ref, atol=2e-2, rtol=2e-2), \
        float(jnp.max(jnp.abs(out - ref)))

    # Training mode: exercise the dropout path (shape / finiteness sanity).
    out_tr = neural_net_forward(x, w1, b1, w2, b2, seed=123, training=True)
    out_tr = jax.block_until_ready(out_tr)
    assert out_tr.shape == (batch, NUM_CLASSES)
    assert bool(jnp.all(jnp.isfinite(out_tr)))

    print("KERNEL_OK")
</pallas_src>

<mosaic_0001>
module attributes {stable_mosaic.version = 11 : i64} {
  func.func @_mlp_kernel(%arg0: i32, %arg1: memref<1xi32, #tpu.memory_space<smem>>, %arg2: memref<8x784xf32, #tpu.memory_space<vmem>>, %arg3: memref<784x128xbf16, #tpu.memory_space<vmem>>, %arg4: memref<1x128xf32, #tpu.memory_space<vmem>>, %arg5: memref<128x10xbf16, #tpu.memory_space<vmem>>, %arg6: memref<1x10xf32, #tpu.memory_space<vmem>>, %arg7: memref<8x10xf32, #tpu.memory_space<vmem>>) attributes {dimension_semantics = [#tpu.dimension_semantics<parallel>], iteration_bounds = array<i64: 1>, scalar_prefetch = 1 : i64, scratch_operands = 0 : i64, tpu.core_type = #tpu.core_type<tc>, window_params = [{transform_indices = @transform_0, window_bounds = array<i64: 8, 784>}, {pipeline_mode = #tpu.pipeline_mode<synchronous>, transform_indices = @transform_1, window_bounds = array<i64: 784, 128>}, {pipeline_mode = #tpu.pipeline_mode<synchronous>, transform_indices = @transform_2, window_bounds = array<i64: 1, 128>}, {pipeline_mode = #tpu.pipeline_mode<synchronous>, transform_indices = @transform_3, window_bounds = array<i64: 128, 10>}, {pipeline_mode = #tpu.pipeline_mode<synchronous>, transform_indices = @transform_4, window_bounds = array<i64: 1, 10>}, {transform_indices = @transform_5, window_bounds = array<i64: 8, 10>}]} {
    %c0 = arith.constant 0 : index
    %c0_0 = arith.constant 0 : index
    %0 = vector.load %arg2[%c0, %c0_0] : memref<8x784xf32, #tpu.memory_space<vmem>>, vector<8x784xf32>
    %1 = arith.truncf %0 : vector<8x784xf32> to vector<8x784xbf16>
    %c0_1 = arith.constant 0 : index
    %c0_2 = arith.constant 0 : index
    %2 = vector.load %arg3[%c0_1, %c0_2] : memref<784x128xbf16, #tpu.memory_space<vmem>>, vector<784x128xbf16>
    %cst = arith.constant dense<0.000000e+00> : vector<8x128xf32>
    %3 = tpu.matmul %1, %2, %cst {dimension_numbers = #tpu.dot_dimension_numbers<[1], [0], [0], [1], [0, 0, 1, 1], [], []>} : vector<8x784xbf16>, vector<784x128xbf16>, vector<8x128xf32> -> vector<8x128xf32>
    %c0_3 = arith.constant 0 : index
    %c0_4 = arith.constant 0 : index
    %4 = vector.load %arg4[%c0_3, %c0_4] : memref<1x128xf32, #tpu.memory_space<vmem>>, vector<1x128xf32>
    %5 = vector.broadcast %4 : vector<1x128xf32> to vector<8x128xf32>
    %6 = arith.addf %3, %5 : vector<8x128xf32>
    %cst_5 = arith.constant 0.000000e+00 : f32
    %7 = vector.broadcast %cst_5 : f32 to vector<8x128xf32>
    %8 = arith.maximumf %6, %7 : vector<8x128xf32>
    %9 = arith.truncf %8 : vector<8x128xf32> to vector<8x128xbf16>
    %c0_6 = arith.constant 0 : index
    %c0_7 = arith.constant 0 : index
    %10 = vector.load %arg5[%c0_6, %c0_7] : memref<128x10xbf16, #tpu.memory_space<vmem>>, vector<128x10xbf16>
    %cst_8 = arith.constant dense<0.000000e+00> : vector<8x10xf32>
    %11 = tpu.matmul %9, %10, %cst_8 {dimension_numbers = #tpu.dot_dimension_numbers<[1], [0], [0], [1], [0, 0, 1, 1], [], []>} : vector<8x128xbf16>, vector<128x10xbf16>, vector<8x10xf32> -> vector<8x10xf32>
    %c0_9 = arith.constant 0 : index
    %c0_10 = arith.constant 0 : index
    %12 = vector.load %arg6[%c0_9, %c0_10] : memref<1x10xf32, #tpu.memory_space<vmem>>, vector<1x10xf32>
    %13 = vector.broadcast %12 : vector<1x10xf32> to vector<8x10xf32>
    %14 = arith.addf %11, %13 : vector<8x10xf32>
    %c0_11 = arith.constant 0 : index
    %c0_12 = arith.constant 0 : index
    %15 = vector.load %arg7[%c0_11, %c0_12] : memref<8x10xf32, #tpu.memory_space<vmem>>, vector<8x10xf32>
    tpu.vector_store %arg7[%c0_11, %c0_12], %14 {strides = array<i32>} : memref<8x10xf32, #tpu.memory_space<vmem>>, vector<8x10xf32>,
    return
  }
  func.func @transform_0(%arg0: i32, %arg1: memref<1xi32, #tpu.memory_space<smem>>) -> (i32, i32) {
    %c0_i32 = arith.constant 0 : i32
    %c0_i32_0 = arith.constant 0 : i32
    return %arg0, %c0_i32 : i32, i32
  }
  func.func @transform_1(%arg0: i32, %arg1: memref<1xi32, #tpu.memory_space<smem>>) -> (i32, i32) {
    %c0_i32 = arith.constant 0 : i32
    %c0_i32_0 = arith.constant 0 : i32
    %c0_i32_1 = arith.constant 0 : i32
    return %c0_i32, %c0_i32_0 : i32, i32
  }
  func.func @transform_2(%arg0: i32, %arg1: memref<1xi32, #tpu.memory_space<smem>>) -> (i32, i32) {
    %c0_i32 = arith.constant 0 : i32
    %c0_i32_0 = arith.constant 0 : i32
    %c0_i32_1 = arith.constant 0 : i32
    return %c0_i32, %c0_i32_0 : i32, i32
  }
  func.func @transform_3(%arg0: i32, %arg1: memref<1xi32, #tpu.memory_space<smem>>) -> (i32, i32) {
    %c0_i32 = arith.constant 0 : i32
    %c0_i32_0 = arith.constant 0 : i32
    %c0_i32_1 = arith.constant 0 : i32
    return %c0_i32, %c0_i32_0 : i32, i32
  }
  func.func @transform_4(%arg0: i32, %arg1: memref<1xi32, #tpu.memory_space<smem>>) -> (i32, i32) {
    %c0_i32 = arith.constant 0 : i32
    %c0_i32_0 = arith.constant 0 : i32
    %c0_i32_1 = arith.constant 0 : i32
    return %c0_i32, %c0_i32_0 : i32, i32
  }
  func.func @transform_5(%arg0: i32, %arg1: memref<1xi32, #tpu.memory_space<smem>>) -> (i32, i32) {
    %c0_i32 = arith.constant 0 : i32
    %c0_i32_0 = arith.constant 0 : i32
    return %arg0, %c0_i32 : i32, i32
  }
}

</mosaic_0001>

<bundles_post_ra>
// kernel: tpu_custom_call.1
= control target key start
LH: loop header
LB: loop body
LE: loop exit
PB: predicated region body
PF: predicated region fallthrough
CT: control target
= control target key end

     0   :  { %12 = vsyncpa [#allocation5], 0  ;;  %s1148_s0 = inlined_call_operand.<no memory space> [shape: s32[1], index: 0, kind: input, shape index: {}]   ;;  %s1149_s1 = inlined_call_operand.vmem [shape: f32[8,784], index: 1, kind: input, shape index: {}]   ;;  %s1150_s2 = inlined_call_operand.hbm [shape: bf16[784,128], index: 2, kind: input, shape index: {}]   ;;  %s1151_s3 = inlined_call_operand.vmem [shape: f32[1,128], index: 3, kind: input, shape index: {}]   ;;  %s1152_s4 = inlined_call_operand.vmem [shape: bf16[128,10], index: 4, kind: input, shape index: {}]   ;;  %s1153_s5 = inlined_call_operand.vmem [shape: f32[1,10], index: 5, kind: input, shape index: {}]   ;;  %s1154_s6 = inlined_call_operand.hbm [shape: f32[8,10], index: 6, kind: output, shape index: {}]  }
   0x1   :  { %13 = vsyncpa [#allocation6], 0  ;;  %s1019_s0 = smov [#allocation4]   ;;  %s971_s24 = scalar_lea.hbm %s1150_s2, 6272 }
   0x2   :  { %s21_s21 = sshll.u32 %s1019_s0, 4  ;;  %p972_p0 = scmp.ne.s32.totalorder %s1150_s2, %s971_s24  ;;  %s22_s21 = int_to_ptr.vmem [resolvable:$true] %s21_s21 }
   0x3   :  { %p975_p1 = scmp.lt.u32.totalorder %s971_s24, %s1150_s2 }
   0x5   :  { %p977_p2 = pnand %p975_p1, %p972_p0 }
   0x7   :  { %980 = shalt.err (!%p977_p2)
}
   0x8   :  { %s981_s29 = scalar_lea.vmem %s22_s21, 6272  ;;  %p986_p4 = scmp.lt.s32.totalorder %s22_s21, %s22_s21 }
   0x9   :  { %p982_p3 = scmp.ne.s32.totalorder %s22_s21, %s981_s29  ;;  %p987_p5 = scmp.lt.s32.totalorder %s981_s29, %s981_s29 }
   0xb   :  { %p988_p6 = por %p987_p5, %p986_p4 }
   0xd   :  { %p989_p7 = pnand %p988_p6, %p982_p3 }
   0xf   :  { %992 = shalt.err (!%p989_p7)
}
  0x10   :  { %s1020_s30 = smov 64   ;;  %s1021_s7 = smov 4  }
  0x11   :  { %27 = dma.hbm_to_vmem [thread:$0]  %s1150_s2, 6272, %s22_s21, [#allocation5], %s1020_s30, %s1020_s30, %s1021_s7  }
  0x12   :  { %1015 = dma.done.wait [#allocation5], 6272  }
  0x13   :  { %1016 = vsyncadd [#allocation5], 4294961024  ;;  %v914_v0 = vld [vmem:[#allocation4 + $0x40] sm:$0xff]   ;;  %v918_v4 = vld [vmem:[#allocation4 + $0x48] sm:$0xff]   ;;  %v1022_v44 = vmov 0.0   ;;  %vm1023_vm0 = vmmov 0  }
  0x14   :  { %v915_v1 = vld [vmem:[#allocation4] sm:$0xff]   ;;  %805 = vmatprep.subr.bf16.mxu0 %v914_v0  ;;  %v919_v5 = vld [vmem:[#allocation4 + $0x8] sm:$0xff]   ;;  %v922_v8 = vld [vmem:[#allocation4 + $0x50] sm:$0xff]   ;;  %vm451_vm1 = vcmask 130048   ;;  %s1024_s14 = smov [#allocation7]   ;;  %vm728_vm2 = vcmask 80896  }
  0x15   :  { %v916_v2 = vld [vmem:[#allocation4 + $0xc0] sm:$0xff]   ;;  %806 = vmatpush3.bf16.msra.mxu0 %v915_v1  ;;  %v920_v6 = vld [vmem:[#allocation4 + $0xc8] sm:$0xff]   ;;  %v923_v9 = vld [vmem:[#allocation4 + $0x10] sm:$0xff]   ;;  %s736_s15 = sshll.u32 %s1024_s14, 4  ;;  %s737_s15 = int_to_ptr.vmem [resolvable:$true] %s736_s15 }
  0x16   :  { %v917_v3 = vld [vmem:[#allocation4 + $0x80] sm:$0xff]   ;;  %827 = vmatprep.subr.bf16.mxu1 %v916_v2  ;;  %807 = vmatprep.subr.bf16.mxu0 %v918_v4  ;;  %v921_v7 = vld [vmem:[#allocation4 + $0x88] sm:$0xff]   ;;  %v924_v10 = vld [vmem:[#allocation4 + $0xd0] sm:$0xff]   ;;  %s993_s16 = scalar_lea.vmem %s737_s15, 128  ;;  %p998_p9 = scmp.lt.s32.totalorder %s737_s15, %s737_s15 }
  0x17   :  { %828 = vmatpush3.bf16.msra.mxu1 %v917_v3  ;;  %v925_v11 = vld [vmem:[#allocation4 + $0x90] sm:$0xff]   ;;  %v926_v12 = vld [vmem:[#allocation4 + $0x58] sm:$0xff]   ;;  %v930_v16 = vld [vmem:[#allocation4 + $0x60] sm:$0xff]   ;;  %p994_p8 = scmp.ne.s32.totalorder %s737_s15, %s993_s16  ;;  %p999_p10 = scmp.lt.s32.totalorder %s993_s16, %s993_s16 }
  0x18   :  { %829 = vmatprep.subr.bf16.mxu1 %v920_v6  ;;  %v927_v13 = vld [vmem:[#allocation4 + $0x18] sm:$0xff]   ;;  %v931_v17 = vld [vmem:[#allocation4 + $0x20] sm:$0xff]   ;;  %v934_v20 = vld [vmem:[#allocation4 + $0x68] sm:$0xff]  }
  0x19   :  { %808 = vmatpush3.bf16.msra.mxu0 %v919_v5  ;;  %v928_v14 = vld [vmem:[#allocation4 + $0xd8] sm:$0xff]   ;;  %v932_v18 = vld [vmem:[#allocation4 + $0xe0] sm:$0xff]   ;;  %v935_v21 = vld [vmem:[#allocation4 + $0x28] sm:$0xff]   ;;  %p1000_p11 = por %p999_p10, %p998_p9 }
  0x1a   :  { %809 = vmatprep.subr.bf16.mxu0 %v922_v8  ;;  %v929_v15 = vld [vmem:[#allocation4 + $0x98] sm:$0xff]   ;;  %v933_v19 = vld [vmem:[#allocation4 + $0xa0] sm:$0xff]   ;;  %v936_v22 = vld [vmem:[#allocation4 + $0xe8] sm:$0xff]  }
  0x1b   :  { %830 = vmatpush3.bf16.msra.mxu1 %v921_v7  ;;  %v937_v23 = vld [vmem:[#allocation4 + $0xa8] sm:$0xff]   ;;  %v938_v24 = vld [vmem:[#allocation4 + $0x70] sm:$0xff]   ;;  %v942_v28 = vld [vmem:[#allocation4 + $0x78] sm:$0xff]   ;;  %p1001_p12 = pnand %p1000_p11, %p994_p8 }
  0x1c   :  { %831 = vmatprep.subr.bf16.mxu1 %v924_v10  ;;  %v939_v25 = vld [vmem:[#allocation4 + $0x30] sm:$0xff]   ;;  %v943_v29 = vld [vmem:[#allocation4 + $0x38] sm:$0xff]   ;;  %v39_v31 = vld [vmem:[%s1149_s1 + $0x8] sm:$0xff] }
  0x1d   :  { %810 = vmatpush3.bf16.msra.mxu0 %v923_v9  ;;  %v940_v26 = vld [vmem:[#allocation4 + $0xf0] sm:$0xff]   ;;  %v944_v30 = vld [vmem:[#allocation4 + $0xf8] sm:$0xff]   ;;  %v46_v32 = vpack.c.bf16 %v39_v31, %v39_v31  ;;  %v38_v34 = vld [vmem:[%s1149_s1] sm:$0xff] }
  0x1e   :  { %811 = vmatprep.subr.bf16.mxu0 %v926_v12  ;;  %v941_v27 = vld [vmem:[#allocation4 + $0xb0] sm:$0xff]   ;;  %v945_v33 = vld [vmem:[#allocation4 + $0xb8] sm:$0xff]   ;;  %v45_v35 = vpack.c.bf16 %v38_v34, %v38_v34  ;;  %v946_v36 = vld [vmem:[#allocation4 + $0x140] sm:$0xff]  }
  0x1f   :  { %832 = vmatpush3.bf16.msra.mxu1 %v925_v11  ;;  %v41_v37 = vld [vmem:[%s1149_s1 + $0x18] sm:$0xff]  ;;  %487 = vmatprep.mubr.bf16.mxu0 %v46_v32  ;;  %v947_v39 = vld [vmem:[#allocation4 + $0x100] sm:$0xff]   ;;  %v40_v40 = vld [vmem:[%s1149_s1 + $0x10] sm:$0xff] }
  0x20   :  { %833 = vmatprep.subr.bf16.mxu1 %v928_v14  ;;  %v48_v38 = vpack.c.bf16 %v41_v37, %v41_v37  ;;  %v47_v41 = vpack.c.bf16 %v40_v40, %v40_v40  ;;  %v948_v42 = vld [vmem:[#allocation4 + $0x148] sm:$0xff]   ;;  %v950_v45 = vld [vmem:[#allocation4 + $0x150] sm:$0xff]   ;;  %v952_v47 = vld [vmem:[#allocation4 + $0x158] sm:$0xff]  }
  0x21   :  { %812 = vmatpush3.bf16.msra.mxu0 %v927_v13  ;;  %v949_v43 = vld [vmem:[#allocation4 + $0x108] sm:$0xff]   ;;  %v951_v46 = vld [vmem:[#allocation4 + $0x110] sm:$0xff]   ;;  %v953_v48 = vld [vmem:[#allocation4 + $0x118] sm:$0xff]  }
  0x22   :  { %813 = vmatprep.subr.bf16.mxu0 %v930_v16  ;;  %527 = vmatprep.mubr.bf16.mxu1 %v48_v38  ;;  %v954_v49 = vld [vmem:[#allocation4 + $0x160] sm:$0xff]   ;;  %v956_v51 = vld [vmem:[#allocation4 + $0x168] sm:$0xff]   ;;  %v958_v55 = vld [vmem:[#allocation4 + $0x170] sm:$0xff]  }
  0x23   :  { %834 = vmatpush3.bf16.msra.mxu1 %v929_v15  ;;  %v955_v50 = vld [vmem:[#allocation4 + $0x120] sm:$0xff]   ;;  %v957_v52 = vld [vmem:[#allocation4 + $0x128] sm:$0xff]   ;;  %v44_v57 = vld [vmem:[%s1149_s1 + $0x30] sm:$0xff] }
  0x24   :  { %835 = vmatprep.subr.bf16.mxu1 %v932_v18  ;;  %v962_v53 = vld [vmem:[#allocation4 + $0x180] sm:$0xff]   ;;  %v43_v54 = vld [vmem:[%s1149_s1 + $0x28] sm:$0xff]  ;;  %v51_v58 = vpack.c.bf16 %v44_v57, %v44_v57  ;;  %v959_v59 = vld [vmem:[#allocation4 + $0x130] sm:$0xff]  }
  0x25   :  { %814 = vmatpush3.bf16.msra.mxu0 %v931_v17  ;;  %v50_v56 = vpack.c.bf16 %v43_v54, %v43_v54  ;;  %v960_v60 = vld [vmem:[#allocation4 + $0x178] sm:$0xff]   ;;  %v42_v62 = vld [vmem:[%s1149_s1 + $0x20] sm:$0xff]  ;;  %v964_v1 = vld [vmem:[%s1152_s4 + $0x8] sm:$0xff]  }
  0x26   :  { %815 = vmatprep.subr.bf16.mxu0 %v934_v20  ;;  %v961_v61 = vld [vmem:[#allocation4 + $0x138] sm:$0xff]   ;;  %v49_v63 = vpack.c.bf16 %v42_v62, %v42_v62  ;;  %v963_v0 = vld [vmem:[%s1152_s4] sm:$0xff]   ;;  %v965_v2 = vld [vmem:[%s1152_s4 + $0x10] sm:$0xff]  }
  0x27   :  { %836 = vmatpush3.bf16.msra.mxu1 %v933_v19  ;;  %v966_v3 = vld [vmem:[%s1152_s4 + $0x18] sm:$0xff]   ;;  %v967_v4 = vld [vmem:[%s1152_s4 + $0x20] sm:$0xff]   ;;  %v968_v5 = vld [vmem:[%s1152_s4 + $0x28] sm:$0xff]  }
  0x28   :  { %837 = vmatprep.subr.bf16.mxu1 %v936_v22  ;;  %v969_v6 = vld [vmem:[%s1152_s4 + $0x30] sm:$0xff]   ;;  %v970_v7 = vld [vmem:[%s1152_s4 + $0x38] sm:$0xff]   ;;  %v745_v9 = vld [vmem:[%s1151_s3] ss:$0 sm:$0xff] }
  0x29   :  { %816 = vmatpush3.bf16.msra.mxu0 %v935_v21  ;;  %v796_v34 = vld [vmem:[%s1153_s5] ss:$0 sm:$0xff] }
  0x2a   :  { %817 = vmatprep.subr.bf16.mxu0 %v938_v24 }
  0x2b   :  { %838 = vmatpush3.bf16.msra.mxu1 %v937_v23 }
  0x2c   :  { %839 = vmatprep.subr.bf16.mxu1 %v940_v26 }
  0x2d   :  { %818 = vmatpush3.bf16.msra.mxu0 %v939_v25 }
  0x2e   :  { %819 = vmatprep.subr.bf16.mxu0 %v942_v28 }
  0x2f   :  { %840 = vmatpush3.bf16.msra.mxu1 %v941_v27 }
  0x30   :  { %841 = vmatprep.subr.bf16.mxu1 %v944_v30 }
  0x31   :  { %820 = vmatpush3.bf16.msra.mxu0 %v943_v29 }
  0x32   :  { %849 = vmatprep.subr.bf16.mxu0 %v946_v36 }
  0x33   :  { %842 = vmatpush3.bf16.msra.mxu1 %v945_v33 }
  0x34   :  { %488 = vmatmul.mubr.bf16.vlgmr.msra.gmra.mrb[0].mxu0 %v45_v35  ;;  %882 = vmatprep.subr.bf16.mxu1 %v1022_v44 }
  0x35   :  { %850 = vmatpush3.bf16.msra.mxu0 %v947_v39  ;;  %567 = vmatprep.mubr.bf16.mxu0 %v50_v56 }
  0x36   :  { %528 = vmatmul.mubr.bf16.vlgmr.msra.gmra.mrb[0].mxu1 %v47_v41  ;;  %851 = vmatprep.subr.bf16.mxu0 %v948_v42 }
  0x37   :  { %884 = vmatprep.mubr.msk.bf16.mxu1 %vm1023_vm0, %v1022_v44  ;;  %883 = vmatpush3.bf16.msra.mxu1 %v962_v53 }
  0x38   :  { %888 = vmatprep.subr.bf16.mxu1 %v1022_v44 }
  0x39   :  { %852 = vmatpush3.bf16.msra.mxu0 %v949_v43 }
  0x3a   :  { %853 = vmatprep.subr.bf16.mxu0 %v950_v45 }
  0x3d   :  { %854 = vmatpush3.bf16.msra.mxu0 %v951_v46 }
  0x3e   :  { %855 = vmatprep.subr.bf16.mxu0 %v952_v47  ;;  %885 = vmatmul.mubr.msk.bf16.vlgmr.msra.gmra.mrb[4].mxu1 %vm451_vm1, %v51_v58 }
  0x3f   :  { %904 = vmatprep.mubr.msk.bf16.mxu1 %vm1023_vm0, %v1022_v44  ;;  %889 = vmatpush3.bf16.msra.mxu1 %v963_v0 }
  0x40   :  { %890 = vmatprep.subr.bf16.mxu1 %v1022_v44 }
  0x41   :  { %856 = vmatpush3.bf16.msra.mxu0 %v953_v48 }
  0x42   :  { %857 = vmatprep.subr.bf16.mxu0 %v954_v49 }
  0x43   :  { %891 = vmatpush3.bf16.msra.mxu1 %v964_v1 }
  0x44   :  { %892 = vmatprep.subr.bf16.mxu1 %v1022_v44 }
  0x45   :  { %858 = vmatpush3.bf16.msra.mxu0 %v955_v50 }
  0x46   :  { %859 = vmatprep.subr.bf16.mxu0 %v956_v51 }
  0x47   :  { %893 = vmatpush3.bf16.msra.mxu1 %v965_v2 }
  0x48   :  { %894 = vmatprep.subr.bf16.mxu1 %v1022_v44 }
  0x49   :  { %860 = vmatpush3.bf16.msra.mxu0 %v957_v52 }
  0x4a   :  { %861 = vmatprep.subr.bf16.mxu0 %v958_v55 }
  0x4b   :  { %895 = vmatpush3.bf16.msra.mxu1 %v966_v3 }
  0x4c   :  { %896 = vmatprep.subr.bf16.mxu1 %v1022_v44 }
  0x4d   :  { %862 = vmatpush3.bf16.msra.mxu0 %v959_v59 }
  0x4e   :  { %863 = vmatprep.subr.bf16.mxu0 %v960_v60 }
  0x4f   :  { %897 = vmatpush3.bf16.msra.mxu1 %v967_v4 }
  0x50   :  { %898 = vmatprep.subr.bf16.mxu1 %v1022_v44 }
  0x51   :  { %864 = vmatpush3.bf16.msra.mxu0 %v961_v61 }
  0x53   :  { %899 = vmatpush3.bf16.msra.mxu1 %v968_v5 }
  0x54   :  { %568 = vmatmul.mubr.bf16.vlgmr.msra.gmra.mrb[4].mxu0 %v49_v63  ;;  %900 = vmatprep.subr.bf16.mxu1 %v1022_v44 }
  0x57   :  { %901 = vmatpush3.bf16.msra.mxu1 %v969_v6 }
  0x58   :  { %902 = vmatprep.subr.bf16.mxu1 %v1022_v44 }
  0x5b   :  { %903 = vmatpush3.bf16.msra.mxu1 %v970_v7 }
 0x107   :  { %v821_v8 = vpop.f32.mrb[0].mxu0 }
 0x108   :  { %v822_v10 = vpop.f32.mrb[1].mxu0 }
 0x109   :  { %v823_v11 = vadd.f32 %v822_v10, %v821_v8  ;;  %v824_v12 = vpop.f32.mrb[2].mxu0  ;;  %v843_v13 = vpop.f32.mrb[0].mxu1 }
 0x10a   :  { %v825_v14 = vpop.f32.mrb[3].mxu0  ;;  %v844_v16 = vpop.f32.mrb[1].mxu1 }
 0x10b   :  { %v490_v15 = vadd.f32 %v823_v11, %v745_v9  ;;  %v845_v17 = vadd.f32 %v844_v16, %v843_v13  ;;  %v846_v18 = vpop.f32.mrb[2].mxu1 }
 0x10c   :  { %v847_v19 = vpop.f32.mrb[3].mxu1 }
 0x10d   :  { %v530_v20 = vadd.f32 %v845_v17, %v490_v15 }
 0x111   :  { %v609_v21 = vpop.f32.mrb[4].mxu1 }
 0x112   :  { %v886_v22 = vpop.f32.mrb[5].mxu1 }
 0x113   :  { %v612_v23 = vpop.f32.mrb[6].mxu1 }
 0x114   :  { %v887_v24 = vpop.f32.mrb[7].mxu1 }
 0x127   :  { %v865_v25 = vpop.f32.mrb[4].mxu0 }
 0x128   :  { %v866_v26 = vpop.f32.mrb[5].mxu0 }
 0x129   :  { %v867_v27 = vadd.f32 %v866_v26, %v865_v25  ;;  %v868_v28 = vpop.f32.mrb[6].mxu0 }
 0x12a   :  { %v869_v29 = vpop.f32.mrb[7].mxu0 }
 0x12b   :  { %v570_v30 = vadd.f32 %v867_v27, %v530_v20 }
 0x12d   :  { %v610_v31 = vadd.f32 %v609_v21, %v570_v30 }
 0x12f   :  { %v615_v32 = vmax.f32 %v610_v31, 0.0 }
 0x131   :  { %v616_v33 = vpack.c.bf16 %v615_v32, %v615_v32 }
 0x133   :  { %905 = vmatmul.mubr.bf16.vlgmr.msra.gmra.mrb[8].mxu1 %v616_v33 }
 0x206   :  { %v722_v35 = vpop.f32.mrb[8].mxu1 }
 0x207   :  { %v723_v36 = vadd.f32 %v796_v34, %v722_v35  ;;  %v906_v37 = vpop.f32.mrb[9].mxu1 }
 0x208   :  { %v725_v38 = vpop.f32.mrb[10].mxu1 }
 0x209   :  { %v907_v39 = vpop.f32.mrb[11].mxu1  ;;  %729 = vst.msk [vmem:[#allocation7] sm:$0xff] %vm728_vm2, %v723_v36 }
 0x20a   :  { %1004 = shalt.err (!%p1001_p12)
}
 0x20b   :  { %s1005_s5 = scalar_lea.hbm %s1154_s6, 128 }
 0x20c   :  { %p1006_p13 = scmp.ne.s32.totalorder %s1154_s6, %s1005_s5  ;;  %p1009_p0 = scmp.lt.u32.totalorder %s1005_s5, %s1154_s6 }
 0x20e   :  { %p1011_p1 = pnand %p1009_p0, %p1006_p13 }
 0x210   :  { %1014 = shalt.err (!%p1011_p1)
}
 0x211   :  { %739 = dma.vmem_to_hbm [thread:$0]  %s737_s15, 128, %s1154_s6, [#allocation6]  }
 0x212   :  { %1017 = dma.done.wait [#allocation6], 128  }
 0x213   :  { %1018 = vsyncadd [#allocation6], 4294967168 }
 0x214   :  { %743 = vsyncpa [#allocation5], 1 }
 0x215   :  { %744 = vsyncpa [#allocation6], 1 }

</bundles_post_ra>
